<compile_context>
chip_gen: v7x
topology: tpu7x:2x2x1
jax: 0.10.0
libtpu: 0.0.40
codegen_flags: <defaults>
</compile_context>

<pallas_src>
import functools

import jax
import jax.numpy as jnp
from jax.experimental import pallas as pl
from jax.experimental.pallas import tpu as pltpu


def _round_up(x, m):
    return (x + m - 1) // m * m


def ftn_kernel(a_ref, x_ref, w1_ref, b1_ref, w2_ref, b2_ref, w3_ref, b3_ref,
               o_ref, *, alpha: float):
    """Fused FTNBlock forward on one (Cin, THW) tile of pixels.

    a_ref : (1,)          PReLU slope, SMEM scalar
    x_ref : (Cin, THW)    pixel tile, spatial on lanes
    w1_ref: (Cout, Cin)   conv1_ftn as dense block-diagonal matrix
    b1_ref: (Cout, 1)
    w2_ref: (Cin, Cout)   conv2_ftn as dense block-diagonal matrix
    b2_ref: (Cin, 1)
    w3_ref: (Cin, Cin)    conv3_ftn (dense)
    b3_ref: (Cin, 1)
    o_ref : (Cin, THW)
    """
    x = x_ref[...].astype(jnp.float32)

    # conv1_ftn (1x1, grouped -> dense block-diagonal) + bias
    h = jnp.dot(w1_ref[...], x, preferred_element_type=jnp.float32) + b1_ref[...]

    # PReLU with a single shared slope (scalar read from SMEM)
    a = a_ref[0]
    h = jnp.where(h >= 0, h, a * h)

    # conv2_ftn (1x1, grouped -> dense block-diagonal) + bias
    h = jnp.dot(w2_ref[...], h, preferred_element_type=jnp.float32) + b2_ref[...]

    # conv3_ftn (1x1, dense) + bias
    y = jnp.dot(w3_ref[...], h, preferred_element_type=jnp.float32) + b3_ref[...]

    # residual blend: input*(1-alpha) + y*alpha
    o_ref[...] = (x * (1.0 - alpha) + y * alpha).astype(o_ref.dtype)


def grouped_conv1x1_to_dense(w, groups):
    """PyTorch conv weight (Cout, Cin//groups, 1, 1) -> dense (Cout, Cin) matrix
    such that y = W @ x (channels-first)."""
    w = jnp.squeeze(w, axis=(2, 3))                      # (Cout, Cin//groups)
    c_out, cin_per_g = w.shape
    c_in = cin_per_g * groups
    out_per_g = c_out // groups
    dense = jnp.zeros((c_out, c_in), dtype=w.dtype)
    for g in range(groups):
        blk = w[g * out_per_g:(g + 1) * out_per_g, :]    # (out_per_g, cin_per_g)
        dense = dense.at[g * out_per_g:(g + 1) * out_per_g,
                         g * cin_per_g:(g + 1) * cin_per_g].set(blk)
    return dense


def ftn_block_pallas(x_nchw, params, alpha, *, thw=2048):
    """x_nchw: (N, C, H, W) float32. Returns (N, C, H, W)."""
    n, c_in, hh, ww = x_nchw.shape
    w1d, b1, prelu_a, w2d, b2, w3d, b3 = params
    c_out = w1d.shape[0]

    hw = hh * ww
    x3d = x_nchw.reshape(n, c_in, hw)                    # free reshape, no transpose

    # Lane-dense spatial tile: multiple of 128, no larger than (padded) HW.
    thw = min(int(thw), _round_up(hw, 128))
    thw = _round_up(thw, 128)
    hw_pad = _round_up(hw, thw)
    if hw_pad != hw:                                     # ragged tail -> pad, slice later
        x3d = jnp.pad(x3d, ((0, 0), (0, 0), (0, hw_pad - hw)))

    b1c = b1.reshape(c_out, 1)
    b2c = b2.reshape(c_in, 1)
    b3c = b3.reshape(c_in, 1)
    a_arr = jnp.asarray(prelu_a, jnp.float32).reshape(1)

    grid = (n, hw_pad // thw)

    out3d = pl.pallas_call(
        functools.partial(ftn_kernel, alpha=float(alpha)),
        out_shape=jax.ShapeDtypeStruct((n, c_in, hw_pad), x3d.dtype),
        grid_spec=pltpu.PrefetchScalarGridSpec(
            num_scalar_prefetch=0,
            grid=grid,
            in_specs=[
                pl.BlockSpec(memory_space=pltpu.MemorySpace.SMEM),     # PReLU slope
                pl.BlockSpec((None, c_in, thw), lambda b, i: (b, 0, i)),  # x tile
                pl.BlockSpec((c_out, c_in), lambda b, i: (0, 0)),      # W1
                pl.BlockSpec((c_out, 1), lambda b, i: (0, 0)),         # b1
                pl.BlockSpec((c_in, c_out), lambda b, i: (0, 0)),      # W2
                pl.BlockSpec((c_in, 1), lambda b, i: (0, 0)),          # b2
                pl.BlockSpec((c_in, c_in), lambda b, i: (0, 0)),       # W3
                pl.BlockSpec((c_in, 1), lambda b, i: (0, 0)),          # b3
            ],
            out_specs=pl.BlockSpec((None, c_in, thw), lambda b, i: (b, 0, i)),
        ),
        compiler_params=pltpu.CompilerParams(
            dimension_semantics=("parallel", "parallel")),
    )(a_arr, x3d, w1d, b1c, w2d, b2c, w3d, b3c)

    if hw_pad != hw:
        out3d = out3d[:, :, :hw]
    return out3d.reshape(n, c_in, hh, ww)


def ftn_block_reference(x_nchw, params, alpha):
    """Pure-JAX reference of the PyTorch forward (1x1 convs as channel matmuls)."""
    w1d, b1, a, w2d, b2, w3d, b3 = params
    n, c, hh, ww = x_nchw.shape
    x = x_nchw.reshape(n, c, hh * ww)
    h = jnp.einsum('oc,nck->nok', w1d, x) + b1[None, :, None]
    h = jnp.where(h >= 0, h, a * h)
    h = jnp.einsum('co,nok->nck', w2d, h) + b2[None, :, None]
    y = jnp.einsum('dc,nck->ndk', w3d, h) + b3[None, :, None]
    out = x * (1.0 - alpha) + y * alpha
    return out.reshape(n, c, hh, ww)


def make_params(key, in_nc, out_nc, groups):
    """Deterministic synthetic parameters with the shapes FTNBlock.__init__ implies.

    Note: FTNBlock.init_weights(identity=True) sets conv weights to ones / biases to
    zero, and nn.PReLU(init=1) sets the slope to 1.0.  We use random weights and a
    0.25 slope so every code path (grouping, bias add, negative PReLU branch, blend)
    is numerically exercised; the kernel treats all of them as runtime parameters.
    """
    k1, k2, k3, k4, k5, k6 = jax.random.split(key, 6)
    # PyTorch conv weight shapes: (out, in/groups, 1, 1)
    w1 = 0.1 * jax.random.normal(k1, (out_nc, in_nc // groups, 1, 1), jnp.float32)
    b1 = 0.05 * jax.random.normal(k2, (out_nc,), jnp.float32)
    w2 = 0.1 * jax.random.normal(k3, (in_nc, out_nc // groups, 1, 1), jnp.float32)
    b2 = 0.05 * jax.random.normal(k4, (in_nc,), jnp.float32)
    w3 = 0.1 * jax.random.normal(k5, (in_nc, in_nc, 1, 1), jnp.float32)
    b3 = 0.05 * jax.random.normal(k6, (in_nc,), jnp.float32)
    prelu_a = jnp.float32(0.25)
    w1d = grouped_conv1x1_to_dense(w1, groups)            # (out_nc, in_nc)
    w2d = grouped_conv1x1_to_dense(w2, groups)            # (in_nc, out_nc)
    w3d = grouped_conv1x1_to_dense(w3, 1)                 # (in_nc, in_nc)
    return (w1d, b1, prelu_a, w2d, b2, w3d, b3)


if __name__ == "__main__":
    key = jax.random.PRNGKey(0)
    kx, kp = jax.random.split(key)

    # small shapes: batch=2, in_nc=4, out_nc=8, groups=2, spatial=16x16
    N, IN_NC, OUT_NC, GROUPS, H, W = 2, 4, 8, 2, 16, 16
    ALPHA = 0.3

    x = jax.random.normal(kx, (N, IN_NC, H, W), jnp.float32)
    params = make_params(kp, IN_NC, OUT_NC, GROUPS)

    out = jax.jit(lambda x_: ftn_block_pallas(x_, params, ALPHA))(x)
    out = jax.block_until_ready(out)

    ref = ftn_block_reference(x, params, ALPHA)
    assert out.shape == (N, IN_NC, H, W)
    assert jnp.allclose(out, ref, atol=1e-5, rtol=1e-5), "mismatch vs reference"

    print("KERNEL_OK")
</pallas_src>

<mosaic_0001>
module attributes {stable_mosaic.version = 11 : i64} {
  func.func @ftn_kernel(%arg0: i32, %arg1: i32, %arg2: memref<1xf32, #tpu.memory_space<smem>>, %arg3: memref<1x4x256xf32, #tpu.memory_space<vmem>>, %arg4: memref<8x4xf32, #tpu.memory_space<vmem>>, %arg5: memref<8x1xf32, #tpu.memory_space<vmem>>, %arg6: memref<4x8xf32, #tpu.memory_space<vmem>>, %arg7: memref<4x1xf32, #tpu.memory_space<vmem>>, %arg8: memref<4x4xf32, #tpu.memory_space<vmem>>, %arg9: memref<4x1xf32, #tpu.memory_space<vmem>>, %arg10: memref<1x4x256xf32, #tpu.memory_space<vmem>>) attributes {dimension_semantics = [#tpu.dimension_semantics<parallel>, #tpu.dimension_semantics<parallel>], iteration_bounds = array<i64: 2, 1>, scalar_prefetch = 0 : i64, scratch_operands = 0 : i64, tpu.core_type = #tpu.core_type<tc>, window_params = [{transform_indices = @transform_0, window_bounds = array<i64: 1>}, {transform_indices = @transform_1, window_bounds = array<i64: 1, 4, 256>}, {pipeline_mode = #tpu.pipeline_mode<synchronous>, transform_indices = @transform_2, window_bounds = array<i64: 8, 4>}, {pipeline_mode = #tpu.pipeline_mode<synchronous>, transform_indices = @transform_3, window_bounds = array<i64: 8, 1>}, {pipeline_mode = #tpu.pipeline_mode<synchronous>, transform_indices = @transform_4, window_bounds = array<i64: 4, 8>}, {pipeline_mode = #tpu.pipeline_mode<synchronous>, transform_indices = @transform_5, window_bounds = array<i64: 4, 1>}, {pipeline_mode = #tpu.pipeline_mode<synchronous>, transform_indices = @transform_6, window_bounds = array<i64: 4, 4>}, {pipeline_mode = #tpu.pipeline_mode<synchronous>, transform_indices = @transform_7, window_bounds = array<i64: 4, 1>}, {transform_indices = @transform_8, window_bounds = array<i64: 1, 4, 256>}]} {
    %c0 = arith.constant 0 : index
    %c0_0 = arith.constant 0 : index
    %c0_1 = arith.constant 0 : index
    %0 = vector.load %arg3[%c0, %c0_0, %c0_1] : memref<1x4x256xf32, #tpu.memory_space<vmem>>, vector<1x4x256xf32>
    %1 = vector.shape_cast %0 : vector<1x4x256xf32> to vector<4x256xf32>
    %c0_2 = arith.constant 0 : index
    %c0_3 = arith.constant 0 : index
    %2 = vector.load %arg4[%c0_2, %c0_3] : memref<8x4xf32, #tpu.memory_space<vmem>>, vector<8x4xf32>
    %cst = arith.constant dense<0.000000e+00> : vector<8x256xf32>
    %3 = tpu.matmul %2, %1, %cst {dimension_numbers = #tpu.dot_dimension_numbers<[1], [0], [0], [1], [0, 0, 1, 1], [], []>} : vector<8x4xf32>, vector<4x256xf32>, vector<8x256xf32> -> vector<8x256xf32>
    %c0_4 = arith.constant 0 : index
    %c0_5 = arith.constant 0 : index
    %4 = vector.load %arg5[%c0_4, %c0_5] : memref<8x1xf32, #tpu.memory_space<vmem>>, vector<8x1xf32>
    %5 = vector.broadcast %4 : vector<8x1xf32> to vector<8x256xf32>
    %6 = arith.addf %3, %5 : vector<8x256xf32>
    %c0_6 = arith.constant 0 : index
    %7 = memref.load %arg2[%c0_6] : memref<1xf32, #tpu.memory_space<smem>>
    %cst_7 = arith.constant 0.000000e+00 : f32
    %8 = vector.broadcast %cst_7 : f32 to vector<8x256xf32>
    %9 = arith.cmpf oge, %6, %8 : vector<8x256xf32>
    %10 = vector.broadcast %7 : f32 to vector<8x256xf32>
    %11 = arith.mulf %10, %6 : vector<8x256xf32>
    %12 = arith.select %9, %6, %11 : vector<8x256xi1>, vector<8x256xf32>
    %c0_8 = arith.constant 0 : index
    %c0_9 = arith.constant 0 : index
    %13 = vector.load %arg6[%c0_8, %c0_9] : memref<4x8xf32, #tpu.memory_space<vmem>>, vector<4x8xf32>
    %cst_10 = arith.constant dense<0.000000e+00> : vector<4x256xf32>
    %14 = tpu.matmul %13, %12, %cst_10 {dimension_numbers = #tpu.dot_dimension_numbers<[1], [0], [0], [1], [0, 0, 1, 1], [], []>} : vector<4x8xf32>, vector<8x256xf32>, vector<4x256xf32> -> vector<4x256xf32>
    %c0_11 = arith.constant 0 : index
    %c0_12 = arith.constant 0 : index
    %15 = vector.load %arg7[%c0_11, %c0_12] : memref<4x1xf32, #tpu.memory_space<vmem>>, vector<4x1xf32>
    %16 = vector.broadcast %15 : vector<4x1xf32> to vector<4x256xf32>
    %17 = arith.addf %14, %16 : vector<4x256xf32>
    %c0_13 = arith.constant 0 : index
    %c0_14 = arith.constant 0 : index
    %18 = vector.load %arg8[%c0_13, %c0_14] : memref<4x4xf32, #tpu.memory_space<vmem>>, vector<4x4xf32>
    %cst_15 = arith.constant dense<0.000000e+00> : vector<4x256xf32>
    %19 = tpu.matmul %18, %17, %cst_15 {dimension_numbers = #tpu.dot_dimension_numbers<[1], [0], [0], [1], [0, 0, 1, 1], [], []>} : vector<4x4xf32>, vector<4x256xf32>, vector<4x256xf32> -> vector<4x256xf32>
    %c0_16 = arith.constant 0 : index
    %c0_17 = arith.constant 0 : index
    %20 = vector.load %arg9[%c0_16, %c0_17] : memref<4x1xf32, #tpu.memory_space<vmem>>, vector<4x1xf32>
    %21 = vector.broadcast %20 : vector<4x1xf32> to vector<4x256xf32>
    %22 = arith.addf %19, %21 : vector<4x256xf32>
    %cst_18 = arith.constant 0.699999988 : f32
    %23 = vector.broadcast %cst_18 : f32 to vector<4x256xf32>
    %24 = arith.mulf %1, %23 : vector<4x256xf32>
    %cst_19 = arith.constant 3.000000e-01 : f32
    %25 = vector.broadcast %cst_19 : f32 to vector<4x256xf32>
    %26 = arith.mulf %22, %25 : vector<4x256xf32>
    %27 = arith.addf %24, %26 : vector<4x256xf32>
    %c0_20 = arith.constant 0 : index
    %c0_21 = arith.constant 0 : index
    %c0_22 = arith.constant 0 : index
    %28 = vector.load %arg10[%c0_20, %c0_21, %c0_22] : memref<1x4x256xf32, #tpu.memory_space<vmem>>, vector<1x4x256xf32>
    %29 = vector.shape_cast %28 : vector<1x4x256xf32> to vector<4x256xf32>
    %30 = vector.shape_cast %27 : vector<4x256xf32> to vector<1x4x256xf32>
    tpu.vector_store %arg10[%c0_20, %c0_21, %c0_22], %30 {strides = array<i32>} : memref<1x4x256xf32, #tpu.memory_space<vmem>>, vector<1x4x256xf32>,
    return
  }
  func.func @transform_0(%arg0: i32, %arg1: i32) -> i32 {
    %c0_i32 = arith.constant 0 : i32
    %c0_i32_0 = arith.constant 0 : i32
    return %c0_i32 : i32
  }
  func.func @transform_1(%arg0: i32, %arg1: i32) -> (i32, i32, i32) {
    %c0_i32 = arith.constant 0 : i32
    %c0_i32_0 = arith.constant 0 : i32
    return %arg0, %c0_i32, %arg1 : i32, i32, i32
  }
  func.func @transform_2(%arg0: i32, %arg1: i32) -> (i32, i32) {
    %c0_i32 = arith.constant 0 : i32
    %c0_i32_0 = arith.constant 0 : i32
    %c0_i32_1 = arith.constant 0 : i32
    return %c0_i32, %c0_i32_0 : i32, i32
  }
  func.func @transform_3(%arg0: i32, %arg1: i32) -> (i32, i32) {
    %c0_i32 = arith.constant 0 : i32
    %c0_i32_0 = arith.constant 0 : i32
    %c0_i32_1 = arith.constant 0 : i32
    return %c0_i32, %c0_i32_0 : i32, i32
  }
  func.func @transform_4(%arg0: i32, %arg1: i32) -> (i32, i32) {
    %c0_i32 = arith.constant 0 : i32
    %c0_i32_0 = arith.constant 0 : i32
    %c0_i32_1 = arith.constant 0 : i32
    return %c0_i32, %c0_i32_0 : i32, i32
  }
  func.func @transform_5(%arg0: i32, %arg1: i32) -> (i32, i32) {
    %c0_i32 = arith.constant 0 : i32
    %c0_i32_0 = arith.constant 0 : i32
    %c0_i32_1 = arith.constant 0 : i32
    return %c0_i32, %c0_i32_0 : i32, i32
  }
  func.func @transform_6(%arg0: i32, %arg1: i32) -> (i32, i32) {
    %c0_i32 = arith.constant 0 : i32
    %c0_i32_0 = arith.constant 0 : i32
    %c0_i32_1 = arith.constant 0 : i32
    return %c0_i32, %c0_i32_0 : i32, i32
  }
  func.func @transform_7(%arg0: i32, %arg1: i32) -> (i32, i32) {
    %c0_i32 = arith.constant 0 : i32
    %c0_i32_0 = arith.constant 0 : i32
    %c0_i32_1 = arith.constant 0 : i32
    return %c0_i32, %c0_i32_0 : i32, i32
  }
  func.func @transform_8(%arg0: i32, %arg1: i32) -> (i32, i32, i32) {
    %c0_i32 = arith.constant 0 : i32
    %c0_i32_0 = arith.constant 0 : i32
    return %arg0, %c0_i32, %arg1 : i32, i32, i32
  }
}

</mosaic_0001>

<bundles_post_ra>
// kernel: _lambda_.1
= control target key start
LH: loop header
LB: loop body
LE: loop exit
PB: predicated region body
PF: predicated region fallthrough
CT: control target
= control target key end

     0   :  { %s832_s29 = smov 0   ;;  %s834_s30 = smov 0   ;;  %s896_s0 = inlined_call_operand.<no memory space> [shape: f32[1], index: 0, kind: input, shape index: {}]   ;;  %s897_s1 = inlined_call_operand.vmem [shape: f32[2,4,256], index: 1, kind: input, shape index: {}]   ;;  %s898_s2 = inlined_call_operand.vmem [shape: f32[8,4], index: 2, kind: input, shape index: {}]   ;;  %s899_s3 = inlined_call_operand.vmem [shape: f32[8,1], index: 3, kind: input, shape index: {}]   ;;  %s900_s4 = inlined_call_operand.vmem [shape: f32[4,8], index: 4, kind: input, shape index: {}]   ;;  %s901_s5 = inlined_call_operand.vmem [shape: f32[4,1], index: 5, kind: input, shape index: {}]   ;;  %s902_s6 = inlined_call_operand.vmem [shape: f32[4,4], index: 6, kind: input, shape index: {}]   ;;  %s903_s7 = inlined_call_operand.vmem [shape: f32[4,1], index: 7, kind: input, shape index: {}]   ;;  %s904_s8 = inlined_call_operand.vmem [shape: f32[2,4,256], index: 8, kind: output, shape index: {}]  }
   0x1   :  { %13 = sst [smem:[#allocation2]] %s896_s0  ;;  %s836_s9 = smov 0  }
   0x2 LB: > { %s31_s0 = sadd.s32 1, %s776_s30  ;;  %p713_p0 = scmp.ge.s32.totalorder %s780_s9, 1  ;;  %s780_s9 = sphi %s836_s9, %s19_s9   ;;  %s776_s30 = sphi %s834_s30, %s906_s30   ;;  %s772_s29 = sphi %s832_s29, %s905_s29  }
   0x3   : > { %p33_p1 = scmp.ge.s32.totalorder %s31_s0, 2  ;;  %p284_p2 = scmp.lt.s32.totalorder %s780_s9, 3 }
   0x5   : > { %s908_s0 = smov (%p33_p1, %s31_s0), 0  ;;  %p285_p3 = pnand %p713_p0, %p284_p2 }
   0x6   : > { %p327_p4 = scmp.lt.s32.totalorder (!%p285_p3), %s772_s29, 1  ;;  %v782_v0 = vmov (!%p285_p3), 0.0   ;;  %v783_v1 = vmov (!%p285_p3), 0   ;;  %v348_v2 = vld [vmem:[%s899_s3] sm:$0xff] (!%p285_p3)  ;;  %vm360_vm0 = vcmask (!%p285_p3), 1043456   ;;  %vm356_vm1 = vcmask (!%p285_p3), 31744  }
   0x7   : > { %288 = sbr.rel (%p285_p3) target bundleno = 681 (0x2a9), region = 52  ;;  %429 = vmatprep.mubr.f32.mxu0 (!%p285_p3), %v782_v0  ;;  %755 = vset.pattern.permute.xlu0 (!%p285_p3), %v783_v1  ;;  %v445_v3 = vld [vmem:[%s901_s5] sm:$0xf] (!%p285_p3)  ;;  %s436_s20 = sld [smem:[#allocation2]] (!%p285_p3)  ;;  %vm451_vm4 = vcmask (!%p285_p3), 64512  }
   0x8   : > { %351 = vperm.xlu0 (!%p285_p3), %755, %v348_v2   ;;  %519 = vmatprep.mubr.f32.mxu1 (!%p285_p3), %v782_v0  ;;  %v347_v6 = vld [vmem:[%s898_s2] sm:$0xff] (!%p285_p3) }
   0x9   : > { %756 = vset.pattern.permute.xlu1 (!%p285_p3), %v783_v1  ;;  %v444_v16 = vld [vmem:[%s900_s4] sm:$0xf] (!%p285_p3) }
   0xa   : > { %v527_v18 = vld [vmem:[%s903_s7] sm:$0xf] (!%p285_p3) }
   0xb   : > { %530 = vperm.xlu1 (!%p285_p3), %756, %v527_v18   ;;  %v526_v24 = vld [vmem:[%s902_s6] sm:$0xf] (!%p285_p3) }
   0xc   : > { %448 = vperm.xlu0 (!%p285_p3), %755, %v445_v3  }
   0xd   : > { %v439_v9 = vstv (!%p285_p3), %s436_s20 }
   0xe   : > { %s910_s29 = smov (!%p327_p4, %s772_s29), 1 }
   0xf   : > { %s727_s14 = sshll.u32 %s910_s29, 3 }
  0x10   : > { %s334_s17 = scalar_lea.vmem %s897_s1, %s727_s14  ;;  %s344_s10 = scalar_lea.vmem %s904_s8, %s727_s14 }
  0x11   : > { %v346_v4 = vld [vmem:[%s334_s17] sm:$0xff] }
  0x12   : > { %v355_v5 = vcombine.high %v346_v4, %v346_v4  ;;  %v613_v31 = vmul.f32 0.7, %v346_v4 }
  0x14   : > { %718 = vmatprep.subr.msk.mxu0 %vm360_vm0, %v355_v5 }
  0x15   : > { %719 = vmatpush1.msk.msra.mxu0 %vm360_vm0, %v346_v4 }
  0x16   : > { %720 = vmatmul.mubr.msk.f32.vlgmr.msra.gmra.mrb[0].mxu0 %vm356_vm1, %v347_v6 }
  0x17   : > { %606 = vmatprep.mubr.f32.mxu0 %v782_v0 }
  0x87   : > { %v352_v7 = vpop.permute.xlu0 %351 }
  0x8a   : > { %v531_v25 = vpop.permute.xlu1 %530 }
  0x8b   : > { %v449_v20 = vpop.permute.xlu0 %448 }
  0xe9   : > { %v431_v8 = vpop.f32.mrb[0].mxu0 }
  0xea   : > { %v432_v10 = vadd.f32 %v431_v8, %v352_v7  ;;  %v433_v11 = vpop.f32.mrb[1].mxu0 }
  0xeb   : > { %v434_v12 = vadd.f32 %v433_v11, %v352_v7 }
  0xec   : > { %v440_v13 = vmul.f32 %v439_v9, %v432_v10  ;;  %vm437_vm3 = vcmp.ge.f32.partialorder %v432_v10, 0.0 }
  0xed   : > { %vm438_vm2 = vcmp.ge.f32.partialorder %v434_v12, 0.0  ;;  %v441_v14 = vmul.f32 %v439_v9, %v434_v12 }
  0xee   : > { %v442_v17 = vsel %vm437_vm3, %v432_v10, %v440_v13 }
  0xef   : > { %v443_v15 = vsel %vm438_vm2, %v434_v12, %v441_v14 }
  0xf0   : > { %455 = vmatprep.subr.mxu1 %v443_v15 }
  0xf1   : > { %456 = vmatpush1.msra.mxu1 %v442_v17 }
  0xf2   : > { %721 = vmatmul.mubr.msk.f32.vlgmr.msra.gmra.mrb[0].mxu1 %vm451_vm4, %v444_v16 }
 0x1c5   : > { %v521_v19 = vpop.f32.mrb[0].mxu1 }
 0x1c6   : > { %v523_v21 = vpop.f32.mrb[1].mxu1  ;;  %v522_v23 = vadd.f32 %v521_v19, %v449_v20 }
 0x1c7   : > { %v524_v22 = vadd.f32 %v523_v21, %v449_v20 }
 0x1c9   : > { %722 = vmatprep.subr.msk.mxu0 %vm360_vm0, %v524_v22 }
 0x1ca   : > { %723 = vmatpush1.msk.msra.mxu0 %vm360_vm0, %v522_v23 }
 0x1cb   : > { %724 = vmatmul.mubr.msk.f32.vlgmr.msra.gmra.mrb[2].mxu0 %vm356_vm1, %v526_v24 }
 0x29e   : > { %v608_v26 = vpop.f32.mrb[2].mxu0 }
 0x29f   : > { %v609_v27 = vadd.f32 %v608_v26, %v531_v25  ;;  %v610_v28 = vpop.f32.mrb[3].mxu0 }
 0x2a0   : > { %v611_v29 = vadd.f32 %v610_v28, %v531_v25 }
 0x2a1   : > { %v614_v30 = vmul.f32 0.3, %v609_v27 }
 0x2a2   : > { %v615_v32 = vmul.f32 0.3, %v611_v29 }
 0x2a4   : > { %v618_v33 = vcombine.low %v614_v30, %v615_v32 }
 0x2a6   : > { %v620_v34 = vadd.f32 %v618_v33, %v613_v31 }
 0x2a8   : > { %621 = vst [vmem:[%s344_s10] sm:$0xff] %v620_v34 }
 0x2a9 PF: > { %s19_s9 = sadd.s32 1, %s780_s9   ;;  %s905_s29 = smov %s776_s30 }
 0x2aa   : > { %p16_p5 = scmp.ge.s32.totalorder %s19_s9, 4   ;;  %s906_s30 = smov %s908_s0 }
 0x2ac   :  { %18 = sbr.rel (!%p16_p5) target bundleno = 2 (0x2), region = 82 }

</bundles_post_ra>
